<compile_context>
chip_gen: v5e
topology: v5e:2x2
jax: 0.10.0
libtpu: 0.0.40
codegen_flags: <defaults>
</compile_context>

<pallas_src>
import functools

import jax
import jax.numpy as jnp
from jax import lax
from jax.experimental import pallas as pl
from jax.experimental.pallas import tpu as pltpu


def _round_up(x, m):
    return ((x + m - 1) // m) * m


def _vmem_capacity_bytes():
    try:
        return int(pltpu.get_tpu_info().vmem_capacity_bytes)
    except Exception:
        return 64 * 1024 * 1024  # conservative: v7x per-TensorCore VMEM


# ---------------------------------------------------------------------------
# Fast path: embedding table resident in VMEM, gather with vector loads.
# ---------------------------------------------------------------------------
def _gather_vmem_kernel(ids_smem, table_ref, out_ref, *,
                        token_tile, vocab_size, unroll):
    # ids_smem:  (n_pad,)            int32 token ids, scalar-prefetched (SMEM)
    # table_ref: (V, E_pad)          whole table, resident in VMEM
    # out_ref:   (token_tile, E_pad) VMEM output block for this grid step
    step = pl.program_id(0)
    base = step * token_tile

    def body(u, carry):
        t0 = pl.multiple_of(u * unroll, unroll)
        for j in range(unroll):  # static unroll: LLO scheduler visibility
            t = t0 + j
            row = jnp.clip(ids_smem[base + t], 0, vocab_size - 1)
            out_ref[pl.ds(t, 1), :] = table_ref[pl.ds(row, 1), :]
        return carry

    lax.fori_loop(0, token_tile // unroll, body, 0)


# ---------------------------------------------------------------------------
# Large-vocab path: table stays in HBM, wave-pipelined per-row DMA gather.
# ---------------------------------------------------------------------------
def _gather_hbm_kernel(ids_smem, table_hbm, out_ref, sems, *,
                       token_tile, vocab_size, wave):
    # table_hbm: (V, E_pad)  embedding table left in HBM (pl.ANY)
    # sems:      (2, wave)   rotating DMA semaphores (double-buffered waves)
    step = pl.program_id(0)
    base = step * token_tile
    num_waves = token_tile // wave

    def descriptor(t, row, slot, j):
        return pltpu.make_async_copy(
            table_hbm.at[pl.ds(row, 1), :],   # one (1, E_pad) row from HBM
            out_ref.at[pl.ds(t, 1), :],       # straight into the output block
            sems.at[slot, j],
        )

    def issue_wave(w, slot):
        t0 = w * wave
        for j in range(wave):                 # static unroll
            t = t0 + j
            row = jnp.clip(ids_smem[base + t], 0, vocab_size - 1)
            descriptor(t, row, slot, j).start()

    def wait_wave(w, slot):
        t0 = w * wave
        for j in range(wave):
            t = t0 + j
            # Rebuild the *same* descriptor (symmetric src/dst) for the wait.
            row = jnp.clip(ids_smem[base + t], 0, vocab_size - 1)
            descriptor(t, row, slot, j).wait()

    issue_wave(0, 0)

    def body(w, carry):
        @pl.when(w + 1 < num_waves)
        def _():
            issue_wave(w + 1, (w + 1) % 2)    # overlap next wave with this wait
        wait_wave(w, w % 2)
        return carry

    lax.fori_loop(0, num_waves, body, 0)


# ---------------------------------------------------------------------------
# Wrapper
# ---------------------------------------------------------------------------
def language_encoder_forward(token_ids, embedding_table, *,
                             token_tile=None, wave=8, force_resident=None):
    """token_ids: (B, S) integer, embedding_table: (V, E) -> (B, S, E)."""
    B, S = token_ids.shape
    V, E = embedding_table.shape
    N = B * S
    itemsize = jnp.dtype(embedding_table.dtype).itemsize

    # Lane-dense output/table: pad E up to a multiple of 128 when needed.
    E_pad = _round_up(E, 128)
    table = embedding_table
    if E_pad != E:
        table = jnp.pad(table, ((0, 0), (0, E_pad - E)))

    table_bytes = V * E_pad * itemsize
    vmem_cap = _vmem_capacity_bytes()
    if force_resident is None:
        # ~21 MiB threshold on v7x (64 MiB VMEM), ~42 MiB on v5e/v6e (128 MiB):
        # leaves room for the double-buffered output block + pipeline headroom.
        resident = table_bytes <= vmem_cap // 3
    else:
        resident = bool(force_resident)

    if token_tile is None:
        token_tile = 128 if resident else 512
    # Multiple of 8 (sublane); clamp so the grid has >= 2 steps when N allows,
    # so the token axis actually shards across v7x's two TensorCores.
    token_tile = max(8, min(_round_up(token_tile, 8),
                            _round_up(pl.cdiv(N, 2), 8)))
    if not resident:
        token_tile = _round_up(token_tile, wave)

    n_pad = pl.cdiv(N, token_tile) * token_tile
    ids_flat = token_ids.astype(jnp.int32).reshape(N)
    if n_pad != N:
        ids_flat = jnp.pad(ids_flat, (0, n_pad - N), constant_values=0)

    # SMEM guard: a scalar-prefetched int32[n_pad] pads to next_pow2(4*n_pad).
    if pl.next_power_of_2(4 * n_pad) > (512 * 1024):
        # TODO(synk): for very large batch*seq, tile the id stream into SMEM
        # with a BlockSpec(memory_space=SMEM) instead of one prefetched vector.
        raise ValueError(
            f"token stream of {n_pad} ids exceeds the SMEM scalar-prefetch budget")

    out_block_bytes = token_tile * E_pad * itemsize
    # Double-buffered output block (+ resident table, budgeted x2) + slack.
    vmem_needed = 2 * out_block_bytes + (2 * table_bytes if resident else 0) + (8 << 20)
    vmem_limit = int(min(vmem_needed, vmem_cap))

    grid = (n_pad // token_tile,)
    if resident:
        kernel = functools.partial(
            _gather_vmem_kernel, token_tile=token_tile, vocab_size=V,
            unroll=min(8, token_tile))
        in_specs = [pl.BlockSpec((V, E_pad), lambda i, ids: (0, 0))]  # whole table
        scratch_shapes = []
        bytes_accessed = table_bytes + n_pad * 4 + n_pad * E_pad * itemsize
    else:
        kernel = functools.partial(
            _gather_hbm_kernel, token_tile=token_tile, vocab_size=V, wave=wave)
        in_specs = [pl.BlockSpec(memory_space=pl.ANY)]                # stays in HBM
        scratch_shapes = [pltpu.SemaphoreType.DMA((2, wave))]
        bytes_accessed = 2 * n_pad * E_pad * itemsize + n_pad * 4

    out = pl.pallas_call(
        kernel,
        out_shape=jax.ShapeDtypeStruct((n_pad, E_pad), table.dtype),
        grid_spec=pltpu.PrefetchScalarGridSpec(
            num_scalar_prefetch=1,                       # ids -> SMEM
            grid=grid,
            in_specs=in_specs,
            out_specs=pl.BlockSpec((token_tile, E_pad), lambda i, ids: (i, 0)),
            scratch_shapes=scratch_shapes,
        ),
        compiler_params=pltpu.CompilerParams(
            dimension_semantics=("parallel",),
            vmem_limit_bytes=vmem_limit,
        ),
        cost_estimate=pl.CostEstimate(
            flops=0, transcendentals=0, bytes_accessed=int(bytes_accessed)),
    )(ids_flat, table)

    return out[:N, :E].reshape(B, S, E)


def make_embedding_table(key, vocab_size, embedding_size):
    """Synthetic init mirroring nn.Embedding(padding_idx=0): N(0,1), row 0 zeroed."""
    table = jax.random.normal(key, (vocab_size, embedding_size), dtype=jnp.float32)
    table = table.at[0].set(0.0)
    return table


if __name__ == "__main__":
    VOCAB_SIZE = 512
    EMBEDDING_SIZE = 128
    BATCH = 2
    SEQ = 8

    key = jax.random.PRNGKey(0)
    k_table, k_ids = jax.random.split(key)

    table = make_embedding_table(k_table, VOCAB_SIZE, EMBEDDING_SIZE)
    token_ids = jax.random.randint(
        k_ids, (BATCH, SEQ), minval=0, maxval=VOCAB_SIZE, dtype=jnp.int32)
    token_ids = token_ids.at[0, 0].set(0)   # exercise padding_idx=0 row

    ref = jnp.take(table, token_ids, axis=0)

    # 1) Auto dispatch: 256 KiB table -> VMEM-resident gather path.
    out_vmem = jax.block_until_ready(language_encoder_forward(token_ids, table))
    assert out_vmem.shape == (BATCH, SEQ, EMBEDDING_SIZE)
    assert jnp.allclose(out_vmem, ref, atol=1e-6), "VMEM path mismatch vs reference"
    assert jnp.allclose(out_vmem[0, 0], 0.0), "padding_idx=0 row must be zeros"

    # 2) Force the large-vocab HBM wave-DMA path on the same inputs.
    out_hbm = jax.block_until_ready(
        language_encoder_forward(token_ids, table, force_resident=False))
    assert jnp.allclose(out_hbm, ref, atol=1e-6), "HBM path mismatch vs reference"

    # 3) Non-multiple-of-128 embedding size exercises lane padding + slicing.
    table96 = make_embedding_table(k_table, VOCAB_SIZE, 96)
    out96 = jax.block_until_ready(language_encoder_forward(token_ids, table96))
    assert out96.shape == (BATCH, SEQ, 96)
    assert jnp.allclose(out96, jnp.take(table96, token_ids, axis=0), atol=1e-6)

    print("KERNEL_OK")
</pallas_src>

<mosaic_0001>
module attributes {stable_mosaic.version = 11 : i64} {
  func.func @_gather_vmem_kernel(%arg0: i32, %arg1: memref<16xi32, #tpu.memory_space<smem>>, %arg2: memref<512x128xf32, #tpu.memory_space<vmem>>, %arg3: memref<8x128xf32, #tpu.memory_space<vmem>>) attributes {dimension_semantics = [#tpu.dimension_semantics<parallel>], iteration_bounds = array<i64: 2>, scalar_prefetch = 1 : i64, scratch_operands = 0 : i64, tpu.core_type = #tpu.core_type<tc>, window_params = [{pipeline_mode = #tpu.pipeline_mode<synchronous>, transform_indices = @transform_0, window_bounds = array<i64: 512, 128>}, {transform_indices = @transform_1, window_bounds = array<i64: 8, 128>}]} {
    %c8_i32 = arith.constant 8 : i32
    %0 = arith.muli %arg0, %c8_i32 : i32
    %c0_i32 = arith.constant 0 : i32
    %c8_i32_0 = arith.constant 8 : i32
    %1 = arith.muli %c0_i32, %c8_i32_0 : i32
    %2 = tpu.assume_multiple %1, 8 : i32
    %c0_i32_1 = arith.constant 0 : i32
    %3 = arith.addi %2, %c0_i32_1 : i32
    %4 = arith.addi %0, %3 : i32
    %5 = arith.index_cast %4 : i32 to index
    %6 = memref.load %arg1[%5] : memref<16xi32, #tpu.memory_space<smem>>
    %c0_i32_2 = arith.constant 0 : i32
    %c511_i32 = arith.constant 511 : i32
    %7 = arith.maxsi %c0_i32_2, %6 : i32
    %8 = arith.minsi %c511_i32, %7 : i32
    %9 = arith.index_cast %8 : i32 to index
    %c0 = arith.constant 0 : index
    %10 = vector.load %arg2[%9, %c0] : memref<512x128xf32, #tpu.memory_space<vmem>>, vector<1x128xf32>
    %11 = arith.index_cast %3 : i32 to index
    %c0_3 = arith.constant 0 : index
    %12 = vector.load %arg3[%11, %c0_3] : memref<8x128xf32, #tpu.memory_space<vmem>>, vector<1x128xf32>
    tpu.vector_store %arg3[%11, %c0_3], %10 {strides = array<i32>} : memref<8x128xf32, #tpu.memory_space<vmem>>, vector<1x128xf32>,
    %c1_i32 = arith.constant 1 : i32
    %13 = arith.addi %2, %c1_i32 : i32
    %14 = arith.addi %0, %13 : i32
    %15 = arith.index_cast %14 : i32 to index
    %16 = memref.load %arg1[%15] : memref<16xi32, #tpu.memory_space<smem>>
    %c0_i32_4 = arith.constant 0 : i32
    %c511_i32_5 = arith.constant 511 : i32
    %17 = arith.maxsi %c0_i32_4, %16 : i32
    %18 = arith.minsi %c511_i32_5, %17 : i32
    %19 = arith.index_cast %18 : i32 to index
    %c0_6 = arith.constant 0 : index
    %20 = vector.load %arg2[%19, %c0_6] : memref<512x128xf32, #tpu.memory_space<vmem>>, vector<1x128xf32>
    %21 = arith.index_cast %13 : i32 to index
    %c0_7 = arith.constant 0 : index
    %22 = vector.load %arg3[%21, %c0_7] : memref<8x128xf32, #tpu.memory_space<vmem>>, vector<1x128xf32>
    tpu.vector_store %arg3[%21, %c0_7], %20 {strides = array<i32>} : memref<8x128xf32, #tpu.memory_space<vmem>>, vector<1x128xf32>,
    %c2_i32 = arith.constant 2 : i32
    %23 = arith.addi %2, %c2_i32 : i32
    %24 = arith.addi %0, %23 : i32
    %25 = arith.index_cast %24 : i32 to index
    %26 = memref.load %arg1[%25] : memref<16xi32, #tpu.memory_space<smem>>
    %c0_i32_8 = arith.constant 0 : i32
    %c511_i32_9 = arith.constant 511 : i32
    %27 = arith.maxsi %c0_i32_8, %26 : i32
    %28 = arith.minsi %c511_i32_9, %27 : i32
    %29 = arith.index_cast %28 : i32 to index
    %c0_10 = arith.constant 0 : index
    %30 = vector.load %arg2[%29, %c0_10] : memref<512x128xf32, #tpu.memory_space<vmem>>, vector<1x128xf32>
    %31 = arith.index_cast %23 : i32 to index
    %c0_11 = arith.constant 0 : index
    %32 = vector.load %arg3[%31, %c0_11] : memref<8x128xf32, #tpu.memory_space<vmem>>, vector<1x128xf32>
    tpu.vector_store %arg3[%31, %c0_11], %30 {strides = array<i32>} : memref<8x128xf32, #tpu.memory_space<vmem>>, vector<1x128xf32>,
    %c3_i32 = arith.constant 3 : i32
    %33 = arith.addi %2, %c3_i32 : i32
    %34 = arith.addi %0, %33 : i32
    %35 = arith.index_cast %34 : i32 to index
    %36 = memref.load %arg1[%35] : memref<16xi32, #tpu.memory_space<smem>>
    %c0_i32_12 = arith.constant 0 : i32
    %c511_i32_13 = arith.constant 511 : i32
    %37 = arith.maxsi %c0_i32_12, %36 : i32
    %38 = arith.minsi %c511_i32_13, %37 : i32
    %39 = arith.index_cast %38 : i32 to index
    %c0_14 = arith.constant 0 : index
    %40 = vector.load %arg2[%39, %c0_14] : memref<512x128xf32, #tpu.memory_space<vmem>>, vector<1x128xf32>
    %41 = arith.index_cast %33 : i32 to index
    %c0_15 = arith.constant 0 : index
    %42 = vector.load %arg3[%41, %c0_15] : memref<8x128xf32, #tpu.memory_space<vmem>>, vector<1x128xf32>
    tpu.vector_store %arg3[%41, %c0_15], %40 {strides = array<i32>} : memref<8x128xf32, #tpu.memory_space<vmem>>, vector<1x128xf32>,
    %c4_i32 = arith.constant 4 : i32
    %43 = arith.addi %2, %c4_i32 : i32
    %44 = arith.addi %0, %43 : i32
    %45 = arith.index_cast %44 : i32 to index
    %46 = memref.load %arg1[%45] : memref<16xi32, #tpu.memory_space<smem>>
    %c0_i32_16 = arith.constant 0 : i32
    %c511_i32_17 = arith.constant 511 : i32
    %47 = arith.maxsi %c0_i32_16, %46 : i32
    %48 = arith.minsi %c511_i32_17, %47 : i32
    %49 = arith.index_cast %48 : i32 to index
    %c0_18 = arith.constant 0 : index
    %50 = vector.load %arg2[%49, %c0_18] : memref<512x128xf32, #tpu.memory_space<vmem>>, vector<1x128xf32>
    %51 = arith.index_cast %43 : i32 to index
    %c0_19 = arith.constant 0 : index
    %52 = vector.load %arg3[%51, %c0_19] : memref<8x128xf32, #tpu.memory_space<vmem>>, vector<1x128xf32>
    tpu.vector_store %arg3[%51, %c0_19], %50 {strides = array<i32>} : memref<8x128xf32, #tpu.memory_space<vmem>>, vector<1x128xf32>,
    %c5_i32 = arith.constant 5 : i32
    %53 = arith.addi %2, %c5_i32 : i32
    %54 = arith.addi %0, %53 : i32
    %55 = arith.index_cast %54 : i32 to index
    %56 = memref.load %arg1[%55] : memref<16xi32, #tpu.memory_space<smem>>
    %c0_i32_20 = arith.constant 0 : i32
    %c511_i32_21 = arith.constant 511 : i32
    %57 = arith.maxsi %c0_i32_20, %56 : i32
    %58 = arith.minsi %c511_i32_21, %57 : i32
    %59 = arith.index_cast %58 : i32 to index
    %c0_22 = arith.constant 0 : index
    %60 = vector.load %arg2[%59, %c0_22] : memref<512x128xf32, #tpu.memory_space<vmem>>, vector<1x128xf32>
    %61 = arith.index_cast %53 : i32 to index
    %c0_23 = arith.constant 0 : index
    %62 = vector.load %arg3[%61, %c0_23] : memref<8x128xf32, #tpu.memory_space<vmem>>, vector<1x128xf32>
    tpu.vector_store %arg3[%61, %c0_23], %60 {strides = array<i32>} : memref<8x128xf32, #tpu.memory_space<vmem>>, vector<1x128xf32>,
    %c6_i32 = arith.constant 6 : i32
    %63 = arith.addi %2, %c6_i32 : i32
    %64 = arith.addi %0, %63 : i32
    %65 = arith.index_cast %64 : i32 to index
    %66 = memref.load %arg1[%65] : memref<16xi32, #tpu.memory_space<smem>>
    %c0_i32_24 = arith.constant 0 : i32
    %c511_i32_25 = arith.constant 511 : i32
    %67 = arith.maxsi %c0_i32_24, %66 : i32
    %68 = arith.minsi %c511_i32_25, %67 : i32
    %69 = arith.index_cast %68 : i32 to index
    %c0_26 = arith.constant 0 : index
    %70 = vector.load %arg2[%69, %c0_26] : memref<512x128xf32, #tpu.memory_space<vmem>>, vector<1x128xf32>
    %71 = arith.index_cast %63 : i32 to index
    %c0_27 = arith.constant 0 : index
    %72 = vector.load %arg3[%71, %c0_27] : memref<8x128xf32, #tpu.memory_space<vmem>>, vector<1x128xf32>
    tpu.vector_store %arg3[%71, %c0_27], %70 {strides = array<i32>} : memref<8x128xf32, #tpu.memory_space<vmem>>, vector<1x128xf32>,
    %c7_i32 = arith.constant 7 : i32
    %73 = arith.addi %2, %c7_i32 : i32
    %74 = arith.addi %0, %73 : i32
    %75 = arith.index_cast %74 : i32 to index
    %76 = memref.load %arg1[%75] : memref<16xi32, #tpu.memory_space<smem>>
    %c0_i32_28 = arith.constant 0 : i32
    %c511_i32_29 = arith.constant 511 : i32
    %77 = arith.maxsi %c0_i32_28, %76 : i32
    %78 = arith.minsi %c511_i32_29, %77 : i32
    %79 = arith.index_cast %78 : i32 to index
    %c0_30 = arith.constant 0 : index
    %80 = vector.load %arg2[%79, %c0_30] : memref<512x128xf32, #tpu.memory_space<vmem>>, vector<1x128xf32>
    %81 = arith.index_cast %73 : i32 to index
    %c0_31 = arith.constant 0 : index
    %82 = vector.load %arg3[%81, %c0_31] : memref<8x128xf32, #tpu.memory_space<vmem>>, vector<1x128xf32>
    tpu.vector_store %arg3[%81, %c0_31], %80 {strides = array<i32>} : memref<8x128xf32, #tpu.memory_space<vmem>>, vector<1x128xf32>,
    %c1_i32_32 = arith.constant 1 : i32
    return
  }
  func.func @transform_0(%arg0: i32, %arg1: memref<16xi32, #tpu.memory_space<smem>>) -> (i32, i32) {
    %c0_i32 = arith.constant 0 : i32
    %c0_i32_0 = arith.constant 0 : i32
    %c0_i32_1 = arith.constant 0 : i32
    return %c0_i32, %c0_i32_0 : i32, i32
  }
  func.func @transform_1(%arg0: i32, %arg1: memref<16xi32, #tpu.memory_space<smem>>) -> (i32, i32) {
    %c0_i32 = arith.constant 0 : i32
    %c0_i32_0 = arith.constant 0 : i32
    return %arg0, %c0_i32 : i32, i32
  }
}

</mosaic_0001>

<bundles_post_ra>
// kernel: tpu_custom_call.1
= control target key start
LH: loop header
LB: loop body
LE: loop exit
PB: predicated region body
PF: predicated region fallthrough
CT: control target
= control target key end

     0   :  { %s537_s12 = smov [#allocation3]   ;;  %s689_s0 = inlined_call_operand.hbm [shape: s32[16], index: 0, kind: input, shape index: {}]   ;;  %s690_s1 = inlined_call_operand.hbm [shape: f32[512,128], index: 1, kind: input, shape index: {}]   ;;  %s691_s2 = inlined_call_operand.hbm [shape: f32[16,128], index: 2, kind: output, shape index: {}]  }
   0x1   :  { %s8_s11 = sshll.u32 %s689_s0, 4  ;;  %s9_s11 = int_to_ptr.hbm [resolvable:$true] %s8_s11 }
   0x2   :  { %11 = dma.hbm_to_smem %s9_s11, 16, %s537_s12, [#allocation2] }
   0x3   :  { %511 = dma.done.wait [#allocation2], 16 }
   0x4   :  { %512 = vsyncadd [#allocation2], 4294967280 }
   0x5   :  { %14 = sfence }
   0x6   :  { %15 = vsyncpa [#allocation5], 0 }
   0x7   :  { %16 = vsyncpa [#allocation6], 0 }
   0x8   :  { %18 = vsyncpa [#allocation6 + $0x1], 0  ;;  %s559_s13 = smov 0   ;;  %s561_s14 = smov 0  }
   0x9   :  { %s563_s15 = smov 0   ;;  %s565_s16 = smov 0  }
   0xa LB: > { %s580_s0 = sadd.s32 4294967295, %s535_s16   ;;  %s298_s17 = sadd.s32 4294967294, %s535_s16   ;;  %s535_s16 = sphi %s565_s16, %s697_s16   ;;  %s531_s15 = sphi %s563_s15, %s696_s15   ;;  %s527_s14 = sphi %s561_s14, %s695_s14   ;;  %s523_s13 = sphi %s559_s13, %s694_s13  }
   0xb   : > { %s584_s18 = sadd.s32 1, %s535_s16   ;;  %s52_s19 = sadd.s32 1, %s531_s15 }
   0xc   : > { %s49_s20 = ssub.s32 %s535_s16, %s584_s18  ;;  %p62_p0 = scmp.ne.s32.totalorder %s531_s15, %s527_s14 }
   0xd   : > { %p50_p1 = scmp.eq.s32.totalorder %s49_s20, 0  ;;  %p63_p2 = scmp.eq.s32.totalorder %s580_s0, 1 }
   0xe   : > { %p68_p3 = scmp.ne.s32.totalorder %s527_s14, %s523_s13  ;;  %p69_p4 = scmp.eq.s32.totalorder %s298_s17, 1 }
   0xf   : > { %s595_s21 = scalar_select %p50_p1, %s531_s15, %s52_s19  }
  0x10   : > { %p597_p5 = por %p63_p2, %p62_p0  ;;  %p601_p6 = por %p69_p4, %p68_p3 }
  0x11   : > { %p299_p7 = scmp.ge.s32.totalorder %s535_s16, 1  ;;  %p76_p8 = scmp.lt.s32.totalorder %s535_s16, 3 }
  0x12   : > { %p386_p9 = scmp.eq.s32.totalorder %s580_s0, 0  ;;  %s87_s26 = sshll.u32 %s690_s1, 4  ;;  %s88_s26 = int_to_ptr.hbm [resolvable:$true] %s87_s26 }
  0x13   : > { %p77_p10 = pnand %p299_p7, %p76_p8  ;;  %s538_s27 = smov [#allocation4]  }
  0x14   : > { %s89_s28 = sshll.u32 %s538_s27, 4  ;;  %s539_s29 = smov 128   ;;  %s90_s28 = int_to_ptr.vmem [resolvable:$true] %s89_s28 }
  0x15   : > { %p378_p11 = pneg %p77_p10  ;;  %s540_s30 = smov 8  }
  0x16   : > { %105 = sbr.rel (%p77_p10) target bundleno = 72 (0x48), region = 24 }
  0x17   : > { %p379_p12 = pnand %p386_p9, %p378_p11 }
  0x19   : > { %381 = dma.hbm_to_vmem [thread:$0]  (!%p379_p12), %s88_s26, 8192, %s90_s28, [#allocation5], %s539_s29, %s539_s29, %s540_s30  }
  0x1b   : > { %514 = dma.done.wait (%p386_p9), [#allocation5], 8192  }
  0x1c   : > { %516 = vsyncadd (%p386_p9), [#allocation5], 4294959104  ;;  %s118_s3 = sand.u32 1, %s527_s14   ;;  %s619_s4 = sshll.u32 %s580_s0, 3 }
  0x1d   : > { %s303_s5 = sshll.u32 %s118_s3, 3  ;;  %s123_s6 = sld [smem:[#allocation3 + %s619_s4]] }
  0x1e   : > { %s132_s7 = sadd.s32 1, %s619_s4  ;;  %s143_s8 = sadd.s32 2, %s619_s4 }
  0x1f   : > { %s133_s9 = sld [smem:[#allocation3 + %s132_s7]]  ;;  %s154_s10 = sadd.s32 3, %s619_s4 }
  0x20   : > { %s144_s11 = sld [smem:[#allocation3 + %s143_s8]]  ;;  %s165_s12 = sadd.s32 4, %s619_s4 }
  0x21   : > { %s628_s17 = sld [smem:[#allocation3 + %s154_s10]]  ;;  %s176_s0 = sadd.s32 5, %s619_s4 }
  0x22   : > { %s631_s19 = sld [smem:[#allocation3 + %s165_s12]]  ;;  %s187_s20 = sadd.s32 6, %s619_s4 }
  0x23   : > { %p124_p13 = scmp.gt.s32.totalorder %s123_s6, 0  ;;  %p305_p0 = scmp.lt.s32.totalorder %s123_s6, 511 }
  0x24   : > { %s634_s25 = scalar_lea.vmem [#allocation7], %s303_s5  ;;  %s177_s5 = sld [smem:[#allocation3 + %s176_s0]] }
  0x25   : > { %s699_s6 = smov (!%p124_p13, %s123_s6), 0  ;;  %p134_p1 = scmp.gt.s32.totalorder %s133_s9, 0 }
  0x26   : > { %p310_p2 = scmp.lt.s32.totalorder %s133_s9, 511  ;;  %s701_s6 = smov (!%p305_p0, %s699_s6), 511 }
  0x27   : > { %s703_s9 = smov (!%p134_p1, %s133_s9), 0  ;;  %p145_p3 = scmp.gt.s32.totalorder %s144_s11, 0 }
  0x28   : > { %s128_s24 = scalar_lea.vmem [#allocation4], %s701_s6  ;;  %s705_s9 = smov (!%p310_p2, %s703_s9), 511 }
  0x29   : > { %v129_v0 = vld [vmem:[%s128_s24] sm:$0x1]  ;;  %s146_s26 = scalar_select %p145_p3, %s144_s11, 0 }
  0x2a   : > { %130 = vst [vmem:[%s634_s25] sm:$0x1] %v129_v0  ;;  %p316_p4 = scmp.lt.s32.totalorder %s144_s11, 511  ;;  %s138_s27 = scalar_lea.vmem [#allocation4], %s705_s9 }
  0x2b   : > { %v139_v1 = vld [vmem:[%s138_s27] sm:$0x1]  ;;  %p156_p7 = scmp.gt.s32.totalorder %s628_s17, 0  ;;  %p322_p8 = scmp.lt.s32.totalorder %s628_s17, 511 }
  0x2c   : > { %315 = vst [vmem:[%s634_s25 + $0x1] sm:$0x1] %v139_v1  ;;  %s707_s26 = smov (!%p316_p4, %s146_s26), 511  ;;  %p167_p9 = scmp.gt.s32.totalorder %s631_s19, 0 }
  0x2d   : > { %s709_s17 = smov (!%p156_p7, %s628_s17), 0  ;;  %s149_s28 = scalar_lea.vmem [#allocation4], %s707_s26 }
  0x2e   : > { %v150_v2 = vld [vmem:[%s149_s28] sm:$0x1]  ;;  %s711_s17 = smov (!%p322_p8, %s709_s17), 511  ;;  %p328_p10 = scmp.lt.s32.totalorder %s631_s19, 511 }
  0x2f   : > { %321 = vst [vmem:[%s634_s25 + $0x2] sm:$0x1] %v150_v2  ;;  %s168_s29 = scalar_select %p167_p9, %s631_s19, 0 }
  0x30   : > { %s160_s30 = scalar_lea.vmem [#allocation4], %s711_s17  ;;  %s198_s6 = sadd.s32 7, %s619_s4 }
  0x31   : > { %v161_v3 = vld [vmem:[%s160_s30] sm:$0x1]  ;;  %s713_s29 = smov (!%p328_p10, %s168_s29), 511  ;;  %s188_s7 = sld [smem:[#allocation3 + %s187_s20]] }
  0x32   : > { %327 = vst [vmem:[%s634_s25 + $0x3] sm:$0x1] %v161_v3  ;;  %s171_s8 = scalar_lea.vmem [#allocation4], %s713_s29  ;;  %s199_s9 = sld [smem:[#allocation3 + %s198_s6]] }
  0x33   : > { %v172_v4 = vld [vmem:[%s171_s8] sm:$0x1]  ;;  %p178_p11 = scmp.gt.s32.totalorder %s177_s5, 0  ;;  %p334_p12 = scmp.lt.s32.totalorder %s177_s5, 511 }
  0x34   : > { %333 = vst [vmem:[%s634_s25 + $0x4] sm:$0x1] %v172_v4  ;;  %s219_s12 = scalar_lea.hbm %s691_s2, %s619_s4  ;;  %s221_s17 = sshll.u32 %s634_s25, 4  ;;  %s222_s17 = int_to_ptr.vmem [resolvable:$true] %s221_s17 }
  0x35   : > { %s715_s5 = smov (!%p178_p11, %s177_s5), 0  ;;  %s223_s4 = sshll.u32 %s219_s12, 4  ;;  %s224_s4 = int_to_ptr.hbm [resolvable:$true] %s223_s4 }
  0x36   : > { %s717_s5 = smov (!%p334_p12, %s715_s5), 511  ;;  %s209_s26 = scalar_lea.sflag [#allocation6], %s118_s3 }
  0x37   : > { %p189_p13 = scmp.gt.s32.totalorder %s188_s7, 0  ;;  %p340_p0 = scmp.lt.s32.totalorder %s188_s7, 511 }
  0x38   : > { %p200_p1 = scmp.gt.s32.totalorder %s199_s9, 0  ;;  %s182_s0 = scalar_lea.vmem [#allocation4], %s717_s5 }
  0x39   : > { %s719_s7 = smov (!%p189_p13, %s188_s7), 0  ;;  %v183_v5 = vld [vmem:[%s182_s0] sm:$0x1]  ;;  %p346_p2 = scmp.lt.s32.totalorder %s199_s9, 511 }
  0x3a   : > { %s721_s7 = smov (!%p340_p0, %s719_s7), 511  ;;  %339 = vst [vmem:[%s634_s25 + $0x5] sm:$0x1] %v183_v5  ;;  %s481_s27 = sshra.s32 %s224_s4, 4  ;;  %s482_s27 = int_to_ptr.hbm [resolvable:$true] %s481_s27 }
  0x3b   : > { %s201_s19 = scalar_select %p200_p1, %s199_s9, 0 }
  0x3c   : > { %s193_s20 = scalar_lea.vmem [#allocation4], %s721_s7  ;;  %s483_s28 = scalar_lea.hbm %s482_s27, 8 }
  0x3d   : > { %v194_v6 = vld [vmem:[%s193_s20] sm:$0x1]  ;;  %s723_s19 = smov (!%p346_p2, %s201_s19), 511  ;;  %p484_p3 = scmp.ne.s32.totalorder %s482_s27, %s483_s28 }
  0x3e   : > { %345 = vst [vmem:[%s634_s25 + $0x6] sm:$0x1] %v194_v6  ;;  %s204_s24 = scalar_lea.vmem [#allocation4], %s723_s19  ;;  %s487_s5 = scalar_lea.hbm %s691_s2, 16 }
  0x3f   : > { %v205_v7 = vld [vmem:[%s204_s24] sm:$0x1]  ;;  %p485_p4 = pnand %p484_p3, %p597_p5  ;;  %p488_p8 = scmp.lt.s32.totalorder %s482_s27, %s691_s2 }
  0x40   : > { %351 = vst [vmem:[%s634_s25 + $0x7] sm:$0x1] %v205_v7  ;;  %p489_p9 = scmp.lt.s32.totalorder %s487_s5, %s483_s28 }
  0x41   : > { %p486_p7 = pneg %p485_p4 }
  0x42   : > { %p490_p10 = por %p489_p9, %p488_p8 }
  0x44   : > { %p491_p11 = pnand %p490_p10, %p486_p7 }
  0x46   : > { %494 = shalt.err (!%p491_p11)
}
  0x47   : > { %376 = dma.vmem_to_hbm [thread:$0]  (%p597_p5), %s222_s17, 128, %s224_s4, %s209_s26  }
  0x48 PF: > { %p388_p12 = scmp.ge.s32.totalorder %s535_s16, 2  ;;  %s235_s3 = sand.u32 1, %s523_s13  }
  0x49   : > { %s236_s25 = scalar_lea.sflag [#allocation6], %s235_s3 }
  0x4a   : > { %p383_p13 = pnand %p388_p12, %p601_p6 }
  0x4c   : > { %p384_p0 = pneg %p383_p13 }
  0x4e   : > { %518 = dma.done.wait (%p384_p0), %s236_s25, 128  }
  0x4f   : > { %520 = vsyncadd (%p384_p0), %s236_s25, 4294967168  ;;  %p21_p1 = scmp.ge.s32.totalorder %s584_s18, 4   ;;  %s694_s13 = smov %s527_s14 }
  0x50   : > { %s695_s14 = smov %s531_s15  ;;  %s696_s15 = smov %s595_s21 }
  0x51   : > { %s697_s16 = smov %s584_s18  ;;  %23 = sbr.rel (!%p21_p1) target bundleno = 10 (0xa), region = 76 }
  0x56   :  { %242 = vsyncpa [#allocation5], 1 }
  0x57   :  { %244 = vsyncpa [#allocation5 + $0x1], 1 }
  0x58   :  { %245 = vsyncpa [#allocation6], 1 }
  0x59   :  { %247 = vsyncpa [#allocation6 + $0x1], 1 }

</bundles_post_ra>
